<compile_context>
chip_gen: v5e
topology: v5e:2x2
jax: 0.10.0
libtpu: 0.0.40
codegen_flags: <defaults>
</compile_context>

<pallas_src>
import jax
import jax.numpy as jnp
from jax.experimental import pallas as pl
from jax.experimental.pallas import tpu as pltpu


def _round_up(x, m):
    return ((x + m - 1) // m) * m


def _vmem_limit_bytes():
    """Generation-aware VMEM limit (~75% of physical per-core VMEM, capped)."""
    cap = None
    try:
        cap = getattr(pltpu.get_tpu_info(), "vmem_capacity_bytes", None)
    except Exception:
        cap = None
    if not cap:
        cap = 64 * 1024 * 1024                      # conservative: v7x per-TC VMEM
    limit = min((int(cap) * 3) // 4, 112 * 1024 * 1024)
    return max(limit, 32 * 1024 * 1024)


def _choose_group(n_points, n_out):
    """Rows packed per VMEM row: G | n_points, G*n_out as lane-dense as possible."""
    base_density = n_out / _round_up(n_out, 128)
    if base_density >= 0.999 or n_out >= 4096:
        return 1
    best_g, best_density = 1, base_density
    for g in range(2, 129):
        if n_points % g:
            continue
        if n_points // g < 8:                       # keep a sane contraction dim
            continue
        lanes = g * n_out
        if lanes > 4096:
            break
        density = lanes / _round_up(lanes, 128)
        if density > best_density:                  # smallest G at max density
            best_g, best_density = g, density
    return best_g


def _choose_tile(r_b, lanes, g, itemsize, budget):
    """Packed-row tile so pred+target (double-buffered) + weights fit the budget."""
    padded_lanes = _round_up(lanes, 128)
    padded_g = _round_up(max(g, 1), 8)
    bytes_per_row = 2 * (2 * padded_lanes * itemsize + padded_g * 4)
    rows = budget // bytes_per_row
    rows -= rows % 128                              # 128 | tile -> all dtypes' sublane tiles
    if rows < 128:
        rows = 128
    if rows >= r_b:
        return r_b                                  # single full-extent block
    return rows


def _make_kernel(r_b, tile_p, needs_mask):
    """acc[g, l] += sum_rows_in_tile w[g, row] * (pred - target)^2[row, l]."""

    def kernel(pred_ref, tgt_ref, w_ref, out_ref):
        i = pl.program_id(1)

        @pl.when(i == 0)
        def _():
            out_ref[...] = jnp.zeros_like(out_ref)

        diff = pred_ref[...].astype(jnp.float32) - tgt_ref[...].astype(jnp.float32)
        sq = diff * diff                            # (tile_p, lanes) f32
        w = w_ref[...]                              # (g, tile_p) f32

        if needs_mask:
            # Ragged last block: zero (via select, NaN-safe) everything past the
            # real end in both operands so the matmul contribution is exactly 0.
            start = i * tile_p
            rid = jax.lax.broadcasted_iota(jnp.int32, sq.shape, 0) + start
            sq = jnp.where(rid < r_b, sq, 0.0)
            cid = jax.lax.broadcasted_iota(jnp.int32, w.shape, 1) + start
            w = jnp.where(cid < r_b, w, 0.0)

        # Weighted row-reduction on the MXU (idle otherwise): (g, tile_p) x (tile_p, lanes).
        out_ref[...] = out_ref[...] + jnp.dot(w, sq, preferred_element_type=jnp.float32)

    return kernel


def weighted_mse_loss(pred, target, area_weights, data_variances=None,
                      squash=True, tile_rows=None):
    """JAX/Pallas equivalent of WeightedMSELoss.forward.

    pred, target: (bs, lat*lon, n_outputs)   (f32 or bf16)
    area_weights: (lat*lon,)
    data_variances: optional (n_outputs,) inverse variances
    tile_rows: optional override of the packed-row tile (multiple of 128).
    """
    bs, n_points, n_out = pred.shape

    g = _choose_group(n_points, n_out)              # rows packed per VMEM row
    r_b = n_points // g                             # packed rows per batch
    lanes = g * n_out

    # Free views: lane-pack the point axis.  Memory order is preserved, so
    # pred3[b, r, gg*n_out + v] == pred[b, r*g + gg, v].
    pred3 = pred.reshape(bs, r_b, lanes)
    tgt3 = target.reshape(bs, r_b, lanes)
    # Tiny (g, r_b) weight view, lane axis = packed rows (lane-dense), shared
    # by every batch via the grid -> no jnp.tile / no extra HBM pass.
    w_t = area_weights.astype(jnp.float32).reshape(r_b, g).T

    itemsize = jnp.dtype(pred.dtype).itemsize
    vmem_limit = _vmem_limit_bytes()
    if tile_rows is None:
        tile_p = _choose_tile(r_b, lanes, g, itemsize, vmem_limit // 2)
    else:
        t = min(int(tile_rows), r_b)
        t -= t % 128
        tile_p = r_b if (t < 128 or t >= r_b) else t

    nblocks = -(-r_b // tile_p)                     # ceil div
    needs_mask = nblocks * tile_p > r_b

    out_acc = pl.pallas_call(
        _make_kernel(r_b, tile_p, needs_mask),
        out_shape=jax.ShapeDtypeStruct((bs, g, lanes), jnp.float32),
        grid_spec=pltpu.PrefetchScalarGridSpec(
            num_scalar_prefetch=0,
            grid=(bs, nblocks),                     # batch parallel (feeds v7x's 2 TCs)
            in_specs=[
                pl.BlockSpec((None, tile_p, lanes), lambda b, i: (b, i, 0)),   # pred
                pl.BlockSpec((None, tile_p, lanes), lambda b, i: (b, i, 0)),   # target
                pl.BlockSpec((g, tile_p), lambda b, i: (0, i)),                # weights
            ],
            out_specs=pl.BlockSpec((None, g, lanes), lambda b, i: (b, 0, 0)),
        ),
        compiler_params=pltpu.CompilerParams(
            dimension_semantics=("parallel", "arbitrary"),
            vmem_limit_bytes=vmem_limit,
        ),
    )(pred3, tgt3, w_t)

    # Epilogue (cheap JAX glue on tiny arrays): combine batch partials, extract
    # the per-variable block diagonal, apply ivar, normalize.
    acc = jnp.sum(out_acc, axis=0)                  # (g, lanes) f32
    acc3 = acc.reshape(g, g, n_out)
    vec = acc3[jnp.arange(g), jnp.arange(g), :].sum(axis=0)   # (n_out,) f32

    if data_variances is not None:
        vec = vec * data_variances.astype(jnp.float32)

    # Matches PyTorch: mean over variables (1/V) and division by the broadcast
    # weight sum combine to bs * n_out * sum(w) for both squash modes.
    denom = (bs * n_out) * jnp.sum(area_weights.astype(jnp.float32))
    if squash:
        return jnp.sum(vec) / denom                 # scalar
    return vec / denom                              # (n_outputs,)


def _reference(pred, target, area_weights, data_variances=None, squash=True):
    """Pure-JAX transcription of the PyTorch forward, for verification."""
    sq = jnp.square(pred.astype(jnp.float32) - target.astype(jnp.float32))
    if data_variances is not None:
        sq = sq * data_variances
    if squash:
        out = sq.mean(axis=-1)                      # (bs, N)
        w = jnp.broadcast_to(area_weights, out.shape)
        out = out * w
        out = out / jnp.sum(w)
        return out.sum()
    w = jnp.broadcast_to(area_weights[..., None], sq.shape)
    out = sq * w
    out = out / jnp.sum(w)
    return out.sum(axis=(0, 1))


if __name__ == "__main__":
    key = jax.random.PRNGKey(0)
    k1, k2, k3, k4 = jax.random.split(key, 4)

    # Small shapes consistent with the module: (bs, lat*lon, n_outputs), lat=lon=16.
    bs, n_points, n_out = 2, 256, 4
    pred = jax.random.normal(k1, (bs, n_points, n_out), dtype=jnp.float32)
    target = jax.random.normal(k2, (bs, n_points, n_out), dtype=jnp.float32)
    area_weights = jnp.abs(jax.random.normal(k3, (n_points,), dtype=jnp.float32)) + 0.1
    data_variances = jnp.abs(jax.random.normal(k4, (n_out,), dtype=jnp.float32)) + 0.5

    # squash=True (scalar loss), with ivar
    loss = weighted_mse_loss(pred, target, area_weights, data_variances, squash=True)
    loss = jax.block_until_ready(loss)
    ref = _reference(pred, target, area_weights, data_variances, squash=True)
    assert jnp.allclose(loss, ref, rtol=1e-5, atol=1e-6), (loss, ref)

    # squash=False (per-variable loss), no ivar
    loss_v = weighted_mse_loss(pred, target, area_weights, None, squash=False)
    loss_v = jax.block_until_ready(loss_v)
    ref_v = _reference(pred, target, area_weights, None, squash=False)
    assert jnp.allclose(loss_v, ref_v, rtol=1e-5, atol=1e-6), (loss_v, ref_v)

    # Larger ragged case exercising multi-block tiling and the masked-tail path
    # (n_points = 8 * 257 -> G=8, 257 packed rows, tile forced to 128).
    kk = jax.random.split(jax.random.PRNGKey(1), 4)
    bs2, n2, v2 = 2, 2056, 4
    pred_b = jax.random.normal(kk[0], (bs2, n2, v2), dtype=jnp.float32)
    target_b = jax.random.normal(kk[1], (bs2, n2, v2), dtype=jnp.float32)
    w_b = jnp.abs(jax.random.normal(kk[2], (n2,), dtype=jnp.float32)) + 0.1
    iv_b = jnp.abs(jax.random.normal(kk[3], (v2,), dtype=jnp.float32)) + 0.5
    out_b = weighted_mse_loss(pred_b, target_b, w_b, iv_b, squash=False, tile_rows=128)
    out_b = jax.block_until_ready(out_b)
    ref_b = _reference(pred_b, target_b, w_b, iv_b, squash=False)
    assert jnp.allclose(out_b, ref_b, rtol=1e-4, atol=1e-6), (out_b, ref_b)

    # bf16 inputs (upcast to f32 in-register inside the kernel).
    kb = jax.random.split(jax.random.PRNGKey(2), 3)
    pred_h = jax.random.normal(kb[0], (2, 512, 4), dtype=jnp.bfloat16)
    target_h = jax.random.normal(kb[1], (2, 512, 4), dtype=jnp.bfloat16)
    w_h = jnp.abs(jax.random.normal(kb[2], (512,), dtype=jnp.float32)) + 0.1
    loss_h = weighted_mse_loss(pred_h, target_h, w_h, None, squash=True)
    loss_h = jax.block_until_ready(loss_h)
    ref_h = _reference(pred_h, target_h, w_h, None, squash=True)
    assert jnp.allclose(loss_h, ref_h, rtol=1e-4, atol=1e-6), (loss_h, ref_h)

    print("KERNEL_OK")
</pallas_src>

<mosaic_0001>
module attributes {stable_mosaic.version = 11 : i64} {
  func.func @kernel(%arg0: i32, %arg1: i32, %arg2: memref<1x8x128xf32, #tpu.memory_space<vmem>>, %arg3: memref<1x8x128xf32, #tpu.memory_space<vmem>>, %arg4: memref<32x8xf32, #tpu.memory_space<vmem>>, %arg5: memref<1x32x128xf32, #tpu.memory_space<vmem>>) attributes {dimension_semantics = [#tpu.dimension_semantics<parallel>, #tpu.dimension_semantics<arbitrary>], iteration_bounds = array<i64: 2, 1>, scalar_prefetch = 0 : i64, scratch_operands = 0 : i64, tpu.core_type = #tpu.core_type<tc>, window_params = [{transform_indices = @transform_0, window_bounds = array<i64: 1, 8, 128>}, {transform_indices = @transform_1, window_bounds = array<i64: 1, 8, 128>}, {transform_indices = @transform_2, window_bounds = array<i64: 32, 8>}, {transform_indices = @transform_3, window_bounds = array<i64: 1, 32, 128>}]} {
    %c0_i32 = arith.constant 0 : i32
    %0 = arith.cmpi eq, %arg1, %c0_i32 : i32
    %1 = arith.extui %0 : i1 to i32
    %c0_i32_0 = arith.constant 0 : i32
    %2 = arith.cmpi ne, %1, %c0_i32_0 : i32
    scf.if %2 {
      %cst_14 = arith.constant 0.000000e+00 : f32
      %17 = vector.broadcast %cst_14 : f32 to vector<32x128xf32>
      %c0_15 = arith.constant 0 : index
      %c0_16 = arith.constant 0 : index
      %c0_17 = arith.constant 0 : index
      %18 = vector.load %arg5[%c0_15, %c0_16, %c0_17] : memref<1x32x128xf32, #tpu.memory_space<vmem>>, vector<1x32x128xf32>
      %19 = vector.shape_cast %18 : vector<1x32x128xf32> to vector<32x128xf32>
      %20 = vector.shape_cast %17 : vector<32x128xf32> to vector<1x32x128xf32>
      tpu.vector_store %arg5[%c0_15, %c0_16, %c0_17], %20 {strides = array<i32>} : memref<1x32x128xf32, #tpu.memory_space<vmem>>, vector<1x32x128xf32>,
    } else {
    }
    %c0 = arith.constant 0 : index
    %c0_1 = arith.constant 0 : index
    %c0_2 = arith.constant 0 : index
    %3 = vector.load %arg2[%c0, %c0_1, %c0_2] : memref<1x8x128xf32, #tpu.memory_space<vmem>>, vector<1x8x128xf32>
    %4 = vector.shape_cast %3 : vector<1x8x128xf32> to vector<8x128xf32>
    %c0_3 = arith.constant 0 : index
    %c0_4 = arith.constant 0 : index
    %c0_5 = arith.constant 0 : index
    %5 = vector.load %arg3[%c0_3, %c0_4, %c0_5] : memref<1x8x128xf32, #tpu.memory_space<vmem>>, vector<1x8x128xf32>
    %6 = vector.shape_cast %5 : vector<1x8x128xf32> to vector<8x128xf32>
    %7 = arith.subf %4, %6 : vector<8x128xf32>
    %8 = arith.mulf %7, %7 : vector<8x128xf32>
    %c0_6 = arith.constant 0 : index
    %c0_7 = arith.constant 0 : index
    %9 = vector.load %arg4[%c0_6, %c0_7] : memref<32x8xf32, #tpu.memory_space<vmem>>, vector<32x8xf32>
    %c0_8 = arith.constant 0 : index
    %c0_9 = arith.constant 0 : index
    %c0_10 = arith.constant 0 : index
    %10 = vector.load %arg5[%c0_8, %c0_9, %c0_10] : memref<1x32x128xf32, #tpu.memory_space<vmem>>, vector<1x32x128xf32>
    %11 = vector.shape_cast %10 : vector<1x32x128xf32> to vector<32x128xf32>
    %cst = arith.constant dense<0.000000e+00> : vector<32x128xf32>
    %12 = tpu.matmul %9, %8, %cst {dimension_numbers = #tpu.dot_dimension_numbers<[1], [0], [0], [1], [0, 0, 1, 1], [], []>} : vector<32x8xf32>, vector<8x128xf32>, vector<32x128xf32> -> vector<32x128xf32>
    %13 = arith.addf %11, %12 : vector<32x128xf32>
    %c0_11 = arith.constant 0 : index
    %c0_12 = arith.constant 0 : index
    %c0_13 = arith.constant 0 : index
    %14 = vector.load %arg5[%c0_11, %c0_12, %c0_13] : memref<1x32x128xf32, #tpu.memory_space<vmem>>, vector<1x32x128xf32>
    %15 = vector.shape_cast %14 : vector<1x32x128xf32> to vector<32x128xf32>
    %16 = vector.shape_cast %13 : vector<32x128xf32> to vector<1x32x128xf32>
    tpu.vector_store %arg5[%c0_11, %c0_12, %c0_13], %16 {strides = array<i32>} : memref<1x32x128xf32, #tpu.memory_space<vmem>>, vector<1x32x128xf32>,
    return
  }
  func.func @transform_0(%arg0: i32, %arg1: i32) -> (i32, i32, i32) {
    %c0_i32 = arith.constant 0 : i32
    %c0_i32_0 = arith.constant 0 : i32
    return %arg0, %arg1, %c0_i32 : i32, i32, i32
  }
  func.func @transform_1(%arg0: i32, %arg1: i32) -> (i32, i32, i32) {
    %c0_i32 = arith.constant 0 : i32
    %c0_i32_0 = arith.constant 0 : i32
    return %arg0, %arg1, %c0_i32 : i32, i32, i32
  }
  func.func @transform_2(%arg0: i32, %arg1: i32) -> (i32, i32) {
    %c0_i32 = arith.constant 0 : i32
    %c0_i32_0 = arith.constant 0 : i32
    return %c0_i32, %arg1 : i32, i32
  }
  func.func @transform_3(%arg0: i32, %arg1: i32) -> (i32, i32, i32) {
    %c0_i32 = arith.constant 0 : i32
    %c0_i32_0 = arith.constant 0 : i32
    %c0_i32_1 = arith.constant 0 : i32
    return %arg0, %c0_i32, %c0_i32_0 : i32, i32, i32
  }
}

</mosaic_0001>

<bundles_post_ra>
// kernel: tpu_custom_call.1
= control target key start
LH: loop header
LB: loop body
LE: loop exit
PB: predicated region body
PF: predicated region fallthrough
CT: control target
= control target key end

     0   :  { %8 = vsyncpa [#allocation3], 0  ;;  %s717_s0 = inlined_call_operand.vmem [shape: f32[2,8,128], index: 0, kind: input, shape index: {}]   ;;  %s718_s1 = inlined_call_operand.vmem [shape: f32[2,8,128], index: 1, kind: input, shape index: {}]   ;;  %s719_s2 = inlined_call_operand.vmem [shape: f32[32,8], index: 2, kind: input, shape index: {}]   ;;  %s720_s3 = inlined_call_operand.hbm [shape: f32[2,32,128], index: 3, kind: output, shape index: {}]  }
   0x1   :  { %10 = vsyncpa [#allocation3 + $0x1], 0  ;;  %s605_s12 = smov 0   ;;  %s607_s13 = smov 0  }
   0x2   :  { %s609_s14 = smov 0   ;;  %s611_s15 = smov 0  }
   0x3   :  { %s613_s16 = smov 0   ;;  %s615_s17 = smov 0  }
   0x4 LB: > { %s423_s18 = sadd.s32 4294967295, %s581_s17   ;;  %s424_s19 = sadd.s32 4294967294, %s581_s17   ;;  %s581_s17 = sphi %s615_s17, %s16_s17   ;;  %s577_s16 = sphi %s613_s16, %s727_s16   ;;  %s573_s15 = sphi %s611_s15, %s726_s15   ;;  %s569_s14 = sphi %s609_s14, %s725_s14   ;;  %s565_s13 = sphi %s607_s13, %s724_s13   ;;  %s561_s12 = sphi %s605_s12, %s723_s12  }
   0x5   : > { %s28_s20 = sadd.s32 1, %s577_s16  ;;  %s117_s21 = sadd.s32 1, %s569_s14 }
   0x6   : > { %p30_p0 = scmp.ge.s32.totalorder %s28_s20, 2  ;;  %p127_p1 = scmp.ne.s32.totalorder %s569_s14, %s565_s13 }
   0x7   : > { %p128_p2 = scmp.eq.s32.totalorder %s423_s18, 1  ;;  %p133_p3 = scmp.ne.s32.totalorder %s565_s13, %s561_s12 }
   0x8   : > { %s729_s20 = smov (%p30_p0, %s28_s20), 0  ;;  %p134_p5 = scmp.eq.s32.totalorder %s424_s19, 1 }
   0x9   : > { %p645_p4 = por %p128_p2, %p127_p1  ;;  %s114_s23 = ssub.s32 %s577_s16, %s729_s20 }
   0xa   : > { %p428_p6 = scmp.ge.s32.totalorder %s581_s17, 1  ;;  %p115_p7 = scmp.eq.s32.totalorder %s114_s23, 0 }
   0xb   : > { %p652_p8 = por %p134_p5, %p133_p3  ;;  %p179_p9 = scmp.lt.s32.totalorder %s581_s17, 3 }
   0xc   : > { %s658_s25 = scalar_select %p115_p7, %s569_s14, %s117_s21  }
   0xd   : > { %p180_p10 = pnand %p428_p6, %p179_p9 }
   0xe   : > { %p216_p11 = scmp.lt.s32.totalorder (!%p180_p10), %s573_s15, 1  ;;  %s213_s23 = sand.u32 (!%p180_p10), 1, %s565_s13  }
   0xf   : > { %183 = sbr.rel (%p180_p10) target bundleno = 168 (0xa8), region = 32  ;;  %s305_s7 = scalar_lea.sflag (!%p180_p10), [#allocation3], %s213_s23 }
  0x10   : > { %s523_s11 = scalar_lea.hbm (!%p180_p10), %s720_s3, 64 }
  0x14   : > { %s217_s26 = scalar_select %p216_p11, %s573_s15, 1  ;;  %v248_v4 = vld [vmem:[%s719_s2 + $0x10] sm:$0xff]  ;;  %vm254_vm0 = vcmask 64512   ;;  %v249_v5 = vld [vmem:[%s719_s2 + $0x18] sm:$0xff]  ;;  %v246_v6 = vld [vmem:[%s719_s2] sm:$0xff] }
  0x15   : > { %v247_v7 = vld [vmem:[%s719_s2 + $0x8] sm:$0xff] }
  0x16   : > { %s430_s27 = sshll.u32 %s217_s26, 3  ;;  %s429_s26 = sshll.u32 %s213_s23, 5 }
  0x17   : > { %s222_s30 = scalar_lea.vmem %s717_s0, %s430_s27  ;;  %s229_s6 = scalar_lea.vmem %s718_s1, %s430_s27 }
  0x18   : > { %v242_v0 = vld [vmem:[%s222_s30] sm:$0xff]  ;;  %s441_s27 = sshll.u32 %s573_s15, 5  ;;  %s215_s4 = scalar_lea.vmem [#allocation2], %s429_s26 }
  0x19   : > { %v243_v1 = vld [vmem:[%s229_s6] sm:$0xff]  ;;  %s316_s30 = scalar_lea.hbm %s720_s3, %s441_s27  ;;  %s317_s5 = sshll.u32 %s215_s4, 4  ;;  %s318_s5 = int_to_ptr.vmem [resolvable:$true] %s317_s5 }
  0x1a   : > { %v244_v2 = vsub.f32 %v242_v0, %v243_v1  ;;  %s319_s6 = sshll.u32 %s316_s30, 4  ;;  %s320_s6 = int_to_ptr.hbm [resolvable:$true] %s319_s6 }
  0x1b   : > { %s517_s15 = sshra.s32 %s320_s6, 4  ;;  %s518_s15 = int_to_ptr.hbm [resolvable:$true] %s517_s15 }
  0x1c   : > { %v245_v3 = vmul.f32 %v244_v2, %v244_v2  ;;  %s519_s8 = scalar_lea.hbm %s518_s15, 32  ;;  %p524_p1 = scmp.lt.s32.totalorder %s518_s15, %s720_s3 }
  0x1d   : > { %p520_p12 = scmp.ne.s32.totalorder %s518_s15, %s519_s8  ;;  %p525_p2 = scmp.lt.s32.totalorder %s523_s11, %s519_s8 }
  0x1e   : > { %443 = vmatpush.msra.mxu2 %v245_v3  ;;  %444 = vmatpush.msra.mxu3 %v245_v3 }
  0x1f   : > { %434 = vmatmul.msk.f32.vlgmr.msra.gmra.mxu2 %vm254_vm0, %v248_v4  ;;  %435 = vmatmul.msk.f32.vlgmr.msra.gmra.mxu3 %vm254_vm0, %v249_v5  ;;  %p521_p13 = pnand %p520_p12, %p645_p4  ;;  %p526_p3 = por %p525_p2, %p524_p1 }
  0x20   : > { %282 = vmatpush.msra.mxu0 %v245_v3  ;;  %442 = vmatpush.msra.mxu1 %v245_v3 }
  0x21   : > { %432 = vmatmul.msk.f32.vlgmr.msra.gmra.mxu0 %vm254_vm0, %v246_v6  ;;  %433 = vmatmul.msk.f32.vlgmr.msra.gmra.mxu1 %vm254_vm0, %v247_v7  ;;  %p522_p0 = pneg %p521_p13 }
  0x23   : > { %p527_p5 = pnand %p526_p3, %p522_p0 }
  0x9e   : > { %v284_v8 = vpop.f32.mrf.mxu0  ;;  %v287_v9 = vpop.f32.mrf.mxu1 }
  0x9f   : > { %300 = vst [vmem:[%s215_s4] sm:$0xff] %v284_v8 }
  0xa0   : > { %301 = vst [vmem:[%s215_s4 + $0x8] sm:$0xff] %v287_v9 }
  0xa2   : > { %v290_v10 = vpop.f32.mrf.mxu2  ;;  %v293_v11 = vpop.f32.mrf.mxu3 }
  0xa3   : > { %302 = vst [vmem:[%s215_s4 + $0x10] sm:$0xff] %v290_v10 }
  0xa4   : > { %303 = vst [vmem:[%s215_s4 + $0x18] sm:$0xff] %v293_v11 }
  0xa5   : > { %530 = shalt.err (!%p527_p5)
}
  0xa6   : > { %s583_s21 = smov 128   ;;  %s584_s23 = smov 8  }
  0xa7   : > { %445 = dma.vmem_to_hbm [thread:$0]  (%p645_p4), %s318_s5, 512, %s320_s6, %s305_s7, %s583_s21, %s583_s21, %s584_s23  }
  0xa8 PF: > { %p451_p6 = scmp.ge.s32.totalorder %s581_s17, 2  ;;  %s334_s26 = sand.u32 1, %s561_s12  }
  0xa9   : > { %s335_s27 = scalar_lea.sflag [#allocation3], %s334_s26 }
  0xaa   : > { %p448_p7 = pnand %p451_p6, %p652_p8 }
  0xac   : > { %p449_p9 = pneg %p448_p7 }
  0xae   : > { %556 = dma.done.wait (%p449_p9), %s335_s27, 512  }
  0xaf   : > { %558 = vsyncadd (%p449_p9), %s335_s27, 4294966784  ;;  %s16_s17 = sadd.s32 1, %s581_s17   ;;  %s723_s12 = smov %s565_s13 }
  0xb0   : > { %p13_p10 = scmp.ge.s32.totalorder %s16_s17, 4   ;;  %s724_s13 = smov %s569_s14 }
  0xb1   : > { %s725_s14 = smov %s658_s25  ;;  %s726_s15 = smov %s577_s16 }
  0xb2   : > { %s727_s16 = smov %s729_s20  ;;  %15 = sbr.rel (!%p13_p10) target bundleno = 4 (0x4), region = 77 }
  0xb7   :  { %341 = vsyncpa [#allocation3], 1 }
  0xb8   :  { %343 = vsyncpa [#allocation3 + $0x1], 1 }

</bundles_post_ra>
